<compile_context>
chip_gen: v7x
topology: tpu7x:2x2x1
jax: 0.10.0
libtpu: 0.0.40
codegen_flags: <defaults>
</compile_context>

<pallas_src>
import math

import jax
import jax.numpy as jnp
from jax import lax
from jax.experimental import pallas as pl
from jax.experimental.pallas import tpu as pltpu


# Safe scoped-VMEM cap on v5e/v6e/v7x for these tile sizes; raise per generation
# (e.g. 64-96 MiB on v5e/v6e) when scaling to production shapes.
_VMEM_LIMIT = 32 * 1024 * 1024


def _tile(dim, target, align):
    """Largest tile <= target that divides dim and is `align`-aligned, else the full dim."""
    if dim <= target:
        return dim
    t = (target // align) * align
    while t >= align:
        if dim % t == 0:
            return t
        t -= align
    return dim


# -----------------------------------------------------------------------------
# Tiled linear: y = x @ w + b   (bf16 operands, f32 accumulate)
# -----------------------------------------------------------------------------
def _linear_kernel(x_ref, w_ref, b_ref, o_ref, acc_ref):
    @pl.when(pl.program_id(2) == 0)
    def _():
        acc_ref[...] = jnp.zeros_like(acc_ref)

    acc_ref[...] += jnp.dot(x_ref[...], w_ref[...],
                            preferred_element_type=jnp.float32)

    @pl.when(pl.program_id(2) == pl.num_programs(2) - 1)
    def _():
        o_ref[...] = (acc_ref[...] + b_ref[...]).astype(o_ref.dtype)


def _linear(x2d, w, b, out_dtype=jnp.float32, tm=256, tn=256, tk=512):
    """x2d: (M, Cin) bf16; w: (Cin, Cout) bf16; b: (Cout,) f32 -> (M, Cout) out_dtype."""
    M, Cin = x2d.shape
    Cout = w.shape[1]
    tm = _tile(M, tm, 8)
    tn = _tile(Cout, tn, 128)
    tk = _tile(Cin, tk, 128)
    grid = (M // tm, Cout // tn, Cin // tk)
    return pl.pallas_call(
        _linear_kernel,
        out_shape=jax.ShapeDtypeStruct((M, Cout), out_dtype),
        grid=grid,
        in_specs=[
            pl.BlockSpec((tm, tk), lambda i, j, k: (i, k)),
            pl.BlockSpec((tk, tn), lambda i, j, k: (k, j)),
            pl.BlockSpec((1, tn), lambda i, j, k: (0, j)),
        ],
        out_specs=pl.BlockSpec((tm, tn), lambda i, j, k: (i, j)),
        scratch_shapes=[pltpu.VMEM((tm, tn), jnp.float32)],
        compiler_params=pltpu.CompilerParams(
            dimension_semantics=("parallel", "parallel", "arbitrary"),
            vmem_limit_bytes=_VMEM_LIMIT,
        ),
    )(x2d, w, b.reshape(1, Cout))


# -----------------------------------------------------------------------------
# Linformer attention core: one batch element per grid step, all heads inside.
# -----------------------------------------------------------------------------
def _attn_kernel(qkv_ref, e_ref, f_ref, m_ref, o_ref):
    # qkv block: (1, T, 3C) bf16; E/F: (nh, K, T) bf16 (E pre-scaled by 1/sqrt(hd));
    # m: (T, K) f32 additive mask bias; out block: (1, T, C) bf16.
    nh, Kp, T = e_ref.shape
    C = o_ref.shape[2]
    hd = C // nh
    bf16 = jnp.bfloat16

    mbias = m_ref[...]                                     # (T, K) f32, resident
    ys = []
    for h in range(nh):                                    # static unroll over heads
        q = qkv_ref[0, :, h * hd:(h + 1) * hd]             # (T, hd) bf16
        k = qkv_ref[0, :, C + h * hd:C + (h + 1) * hd]     # (T, hd)
        v = qkv_ref[0, :, 2 * C + h * hd:2 * C + (h + 1) * hd]
        E = e_ref[h]                                       # (K, T), carries 1/sqrt(hd)
        Fm = f_ref[h]                                      # (K, T)

        # Low-rank projections: (K, T) @ (T, hd) -> (K, hd), f32 accumulate.
        k_proj = jnp.dot(E, k, preferred_element_type=jnp.float32)
        v_proj = jnp.dot(Fm, v, preferred_element_type=jnp.float32)

        # att = q @ k_proj^T: contract last dims directly (no explicit transpose).
        att = lax.dot_general(q, k_proj.astype(bf16),
                              dimension_numbers=(((1,), (1,)), ((), ())),
                              preferred_element_type=jnp.float32)   # (T, K)
        att = att + mbias

        # Numerically-stable softmax in f32; reciprocal on the EUP slot.
        att_max = jnp.max(att, axis=-1, keepdims=True)
        p = jnp.exp(att - att_max)
        denom = jnp.sum(p, axis=-1, keepdims=True)
        p = p * pl.reciprocal(denom, approx=True)

        ys.append(jnp.dot(p.astype(bf16), v_proj.astype(bf16),
                          preferred_element_type=jnp.float32))      # (T, hd)

    # Single lane-dense (T, C) store per batch element.
    o_ref[0] = jnp.concatenate(ys, axis=-1).astype(o_ref.dtype)


def _attention(qkv, E, F, mask_bias):
    """qkv: (B, T, 3C) bf16; E/F: (nh, K, T) bf16; mask_bias: (T, K) f32 -> (B, T, C) bf16."""
    B, T, C3 = qkv.shape
    C = C3 // 3
    nh, Kp, _ = E.shape
    return pl.pallas_call(
        _attn_kernel,
        out_shape=jax.ShapeDtypeStruct((B, T, C), jnp.bfloat16),
        grid=(B,),
        in_specs=[
            pl.BlockSpec((1, T, C3), lambda b: (b, 0, 0)),
            pl.BlockSpec((nh, Kp, T), lambda b: (0, 0, 0)),   # resident across grid
            pl.BlockSpec((nh, Kp, T), lambda b: (0, 0, 0)),   # resident across grid
            pl.BlockSpec((T, Kp), lambda b: (0, 0)),          # resident across grid
        ],
        out_specs=pl.BlockSpec((1, T, C), lambda b: (b, 0, 0)),
        compiler_params=pltpu.CompilerParams(
            dimension_semantics=("parallel",),
            vmem_limit_bytes=_VMEM_LIMIT,
        ),
    )(qkv, E, F, mask_bias)


# -----------------------------------------------------------------------------
# Parameters & forward wrapper
# -----------------------------------------------------------------------------
def init_params(key, n_embd, n_head, block_size, linformer_k):
    ks = jax.random.split(key, 4)
    std = 0.02
    return {
        # PyTorch nn.Linear weight is (out, in); stored transposed as (in, out).
        "c_attn_w": jax.random.normal(ks[0], (n_embd, 3 * n_embd), jnp.float32) * std,
        "c_attn_b": jnp.zeros((3 * n_embd,), jnp.float32),
        "c_proj_w": jax.random.normal(ks[1], (n_embd, n_embd), jnp.float32) * std,
        "c_proj_b": jnp.zeros((n_embd,), jnp.float32),
        "E": jax.random.normal(ks[2], (n_head, linformer_k, block_size), jnp.float32) * std,
        "F": jax.random.normal(ks[3], (n_head, linformer_k, block_size), jnp.float32) * std,
    }


def prepare_compute_params(params, n_head, T):
    """One-time prep: bf16 weight casts, fold 1/sqrt(hd) into E, build (T, K) mask bias."""
    bf16 = jnp.bfloat16
    C = params["c_attn_w"].shape[0]
    hd = C // n_head
    scale = 1.0 / math.sqrt(hd)
    Kp = params["E"].shape[1]
    row = jnp.arange(T)[:, None]
    col = jnp.arange(Kp)[None, :]
    mask_bias = jnp.where(col <= row, 0.0, -jnp.inf).astype(jnp.float32)
    return {
        "c_attn_w": params["c_attn_w"].astype(bf16),
        "c_attn_b": params["c_attn_b"],
        "c_proj_w": params["c_proj_w"].astype(bf16),
        "c_proj_b": params["c_proj_b"],
        "E": (params["E"][:, :, :T] * scale).astype(bf16),
        "F": params["F"][:, :, :T].astype(bf16),
        "mask_bias": mask_bias,
    }


def linformer_attention_forward(x, cparams):
    # TODO(synk): attn/resid dropout are identity because config.dropout == 0.0;
    # a training-mode dropout would need pltpu.prng_* inside the kernels.
    B, T, C = x.shape
    # c_attn: fused qkv projection; bf16 output feeds the attention kernel directly.
    qkv = _linear(x.reshape(B * T, C).astype(jnp.bfloat16),
                  cparams["c_attn_w"], cparams["c_attn_b"],
                  out_dtype=jnp.bfloat16)
    qkv = qkv.reshape(B, T, 3 * C)
    # attention core: grid over batch, all heads inside the kernel.
    y = _attention(qkv, cparams["E"], cparams["F"], cparams["mask_bias"])   # (B, T, C) bf16
    # c_proj
    out = _linear(y.reshape(B * T, C), cparams["c_proj_w"], cparams["c_proj_b"],
                  out_dtype=jnp.float32)
    return out.reshape(B, T, C)


# -----------------------------------------------------------------------------
# Pure-JAX reference mirroring the kernel's mixed precision (bf16 MXU operands,
# f32 accumulation/softmax) for a tight numerical check.
# -----------------------------------------------------------------------------
def _reference(x, params, n_head):
    B, T, C = x.shape
    hd = C // n_head
    f32, bf16 = jnp.float32, jnp.bfloat16

    xb = x.reshape(B * T, C).astype(bf16)
    qkv = jnp.dot(xb, params["c_attn_w"].astype(bf16),
                  preferred_element_type=f32) + params["c_attn_b"]
    qkv = qkv.astype(bf16).reshape(B, T, 3 * C)
    q, k, v = jnp.split(qkv, 3, axis=2)
    q = q.reshape(B, T, n_head, hd).transpose(0, 2, 1, 3)
    k = k.reshape(B, T, n_head, hd).transpose(0, 2, 1, 3)
    v = v.reshape(B, T, n_head, hd).transpose(0, 2, 1, 3)

    scale = 1.0 / math.sqrt(hd)
    E = (params["E"][:, :, :T] * scale).astype(bf16)
    F = params["F"][:, :, :T].astype(bf16)
    kp = jnp.einsum("hkt,bhtd->bhkd", E, k, preferred_element_type=f32)
    vp = jnp.einsum("hkt,bhtd->bhkd", F, v, preferred_element_type=f32)

    att = jnp.einsum("bhtd,bhkd->bhtk", q, kp.astype(bf16), preferred_element_type=f32)
    Kp = E.shape[1]
    mask = (jnp.arange(Kp)[None, :] <= jnp.arange(T)[:, None])[None, None]
    att = jnp.where(mask, att, -jnp.inf)
    att = jax.nn.softmax(att, axis=-1)

    y = jnp.einsum("bhtk,bhkd->bhtd", att.astype(bf16), vp.astype(bf16),
                   preferred_element_type=f32)
    y = y.transpose(0, 2, 1, 3).reshape(B * T, C).astype(bf16)
    out = jnp.dot(y, params["c_proj_w"].astype(bf16),
                  preferred_element_type=f32) + params["c_proj_b"]
    return out.reshape(B, T, C)


if __name__ == "__main__":
    # Small config consistent with the module: n_embd=32, n_head=4, block_size=8,
    # linformer_k=4, dropout=0.0, bias=True.
    B, T, C = 2, 8, 32
    n_head = 4
    block_size = 8
    linformer_k = 4

    key = jax.random.PRNGKey(0)
    kx, kp = jax.random.split(key)
    x = jax.random.normal(kx, (B, T, C), jnp.float32)
    params = init_params(kp, C, n_head, block_size, linformer_k)
    cparams = prepare_compute_params(params, n_head, T)

    out = linformer_attention_forward(x, cparams)
    out = jax.block_until_ready(out)

    ref = _reference(x, params, n_head)
    assert out.shape == (B, T, C)
    max_err = float(jnp.max(jnp.abs(out - ref)))
    assert jnp.allclose(out, ref, atol=2e-3, rtol=2e-2), f"mismatch vs reference: {max_err}"

    print("KERNEL_OK")
</pallas_src>

<mosaic_0001>
module attributes {stable_mosaic.version = 11 : i64} {
  func.func @_linear_kernel(%arg0: i32, %arg1: i32, %arg2: i32, %arg3: memref<16x32xbf16, #tpu.memory_space<vmem>>, %arg4: memref<32x96xbf16, #tpu.memory_space<vmem>>, %arg5: memref<1x96xf32, #tpu.memory_space<vmem>>, %arg6: memref<16x96xbf16, #tpu.memory_space<vmem>>, %arg7: memref<16x96xf32, #tpu.memory_space<vmem>>) attributes {dimension_semantics = [#tpu.dimension_semantics<parallel>, #tpu.dimension_semantics<parallel>, #tpu.dimension_semantics<arbitrary>], iteration_bounds = array<i64: 1, 1, 1>, scalar_prefetch = 0 : i64, scratch_operands = 1 : i64, tpu.core_type = #tpu.core_type<tc>, window_params = [{transform_indices = @transform_0, window_bounds = array<i64: 16, 32>}, {transform_indices = @transform_1, window_bounds = array<i64: 32, 96>}, {transform_indices = @transform_2, window_bounds = array<i64: 1, 96>}, {transform_indices = @transform_3, window_bounds = array<i64: 16, 96>}]} {
    %c0_i32 = arith.constant 0 : i32
    %0 = arith.cmpi eq, %arg2, %c0_i32 : i32
    %1 = arith.extui %0 : i1 to i32
    %c0_i32_0 = arith.constant 0 : i32
    %2 = arith.cmpi ne, %1, %c0_i32_0 : i32
    scf.if %2 {
      %cst_10 = arith.constant 0.000000e+00 : f32
      %12 = vector.broadcast %cst_10 : f32 to vector<16x96xf32>
      %c0_11 = arith.constant 0 : index
      %c0_12 = arith.constant 0 : index
      %13 = vector.load %arg7[%c0_11, %c0_12] : memref<16x96xf32, #tpu.memory_space<vmem>>, vector<16x96xf32>
      tpu.vector_store %arg7[%c0_11, %c0_12], %12 {strides = array<i32>} : memref<16x96xf32, #tpu.memory_space<vmem>>, vector<16x96xf32>,
    } else {
    }
    %c0 = arith.constant 0 : index
    %c0_1 = arith.constant 0 : index
    %3 = vector.load %arg7[%c0, %c0_1] : memref<16x96xf32, #tpu.memory_space<vmem>>, vector<16x96xf32>
    %c0_2 = arith.constant 0 : index
    %c0_3 = arith.constant 0 : index
    %4 = vector.load %arg3[%c0_2, %c0_3] : memref<16x32xbf16, #tpu.memory_space<vmem>>, vector<16x32xbf16>
    %c0_4 = arith.constant 0 : index
    %c0_5 = arith.constant 0 : index
    %5 = vector.load %arg4[%c0_4, %c0_5] : memref<32x96xbf16, #tpu.memory_space<vmem>>, vector<32x96xbf16>
    %cst = arith.constant dense<0.000000e+00> : vector<16x96xf32>
    %6 = tpu.matmul %4, %5, %cst {dimension_numbers = #tpu.dot_dimension_numbers<[1], [0], [0], [1], [0, 0, 1, 1], [], []>} : vector<16x32xbf16>, vector<32x96xbf16>, vector<16x96xf32> -> vector<16x96xf32>
    %7 = arith.addf %3, %6 : vector<16x96xf32>
    %c0_6 = arith.constant 0 : index
    %c0_7 = arith.constant 0 : index
    %8 = vector.load %arg7[%c0_6, %c0_7] : memref<16x96xf32, #tpu.memory_space<vmem>>, vector<16x96xf32>
    tpu.vector_store %arg7[%c0_6, %c0_7], %7 {strides = array<i32>} : memref<16x96xf32, #tpu.memory_space<vmem>>, vector<16x96xf32>,
    %c0_i32_8 = arith.constant 0 : i32
    %9 = arith.cmpi eq, %arg2, %c0_i32_8 : i32
    %10 = arith.extui %9 : i1 to i32
    %c0_i32_9 = arith.constant 0 : i32
    %11 = arith.cmpi ne, %10, %c0_i32_9 : i32
    scf.if %11 {
      %c0_10 = arith.constant 0 : index
      %c0_11 = arith.constant 0 : index
      %12 = vector.load %arg7[%c0_10, %c0_11] : memref<16x96xf32, #tpu.memory_space<vmem>>, vector<16x96xf32>
      %c0_12 = arith.constant 0 : index
      %c0_13 = arith.constant 0 : index
      %13 = vector.load %arg5[%c0_12, %c0_13] : memref<1x96xf32, #tpu.memory_space<vmem>>, vector<1x96xf32>
      %14 = vector.broadcast %13 : vector<1x96xf32> to vector<16x96xf32>
      %15 = arith.addf %12, %14 : vector<16x96xf32>
      %16 = arith.truncf %15 : vector<16x96xf32> to vector<16x96xbf16>
      %c0_14 = arith.constant 0 : index
      %c0_15 = arith.constant 0 : index
      %17 = vector.load %arg6[%c0_14, %c0_15] : memref<16x96xbf16, #tpu.memory_space<vmem>>, vector<16x96xbf16>
      tpu.vector_store %arg6[%c0_14, %c0_15], %16 {strides = array<i32>} : memref<16x96xbf16, #tpu.memory_space<vmem>>, vector<16x96xbf16>,
    } else {
    }
    return
  }
  func.func @transform_0(%arg0: i32, %arg1: i32, %arg2: i32) -> (i32, i32) {
    %c0_i32 = arith.constant 0 : i32
    return %arg0, %arg2 : i32, i32
  }
  func.func @transform_1(%arg0: i32, %arg1: i32, %arg2: i32) -> (i32, i32) {
    %c0_i32 = arith.constant 0 : i32
    return %arg2, %arg1 : i32, i32
  }
  func.func @transform_2(%arg0: i32, %arg1: i32, %arg2: i32) -> (i32, i32) {
    %c0_i32 = arith.constant 0 : i32
    %c0_i32_0 = arith.constant 0 : i32
    return %c0_i32, %arg1 : i32, i32
  }
  func.func @transform_3(%arg0: i32, %arg1: i32, %arg2: i32) -> (i32, i32) {
    %c0_i32 = arith.constant 0 : i32
    return %arg0, %arg1 : i32, i32
  }
}

</mosaic_0001>

<bundles_post_ra>
// kernel: tpu_custom_call.1
= control target key start
LH: loop header
LB: loop body
LE: loop exit
PB: predicated region body
PF: predicated region fallthrough
CT: control target
= control target key end

     0   :  { %8 = vsyncpa [#allocation4], 0  ;;  %s350_s0 = inlined_call_operand.hbm [shape: bf16[16,32], index: 0, kind: input, shape index: {}]   ;;  %s351_s1 = inlined_call_operand.hbm [shape: bf16[32,96], index: 1, kind: input, shape index: {}]   ;;  %s352_s2 = inlined_call_operand.vmem [shape: f32[1,96], index: 2, kind: input, shape index: {}]   ;;  %s353_s3 = inlined_call_operand.hbm [shape: bf16[16,96], index: 3, kind: output, shape index: {}]  }
   0x1   :  { %9 = vsyncpa [#allocation7], 0 }
   0x2   :  { %10 = vsyncpa [#allocation5], 0  ;;  %s271_s12 = smov [#allocation3]   ;;  %s199_s16 = scalar_lea.hbm %s350_s0, 128 }
   0x3   :  { %s16_s13 = sshll.u32 %s271_s12, 4  ;;  %p200_p0 = scmp.ne.s32.totalorder %s350_s0, %s199_s16  ;;  %s17_s13 = int_to_ptr.vmem [resolvable:$true] %s16_s13 }
   0x4   :  { %p203_p1 = scmp.lt.u32.totalorder %s199_s16, %s350_s0 }
   0x6   :  { %p205_p2 = pnand %p203_p1, %p200_p0 }
   0x8   :  { %208 = shalt.err (!%p205_p2)
}
   0x9   :  { %s209_s21 = scalar_lea.vmem %s17_s13, 128  ;;  %p214_p4 = scmp.lt.s32.totalorder %s17_s13, %s17_s13 }
   0xa   :  { %p210_p3 = scmp.ne.s32.totalorder %s17_s13, %s209_s21  ;;  %p215_p5 = scmp.lt.s32.totalorder %s209_s21, %s209_s21 }
   0xc   :  { %p216_p6 = por %p215_p5, %p214_p4 }
   0xe   :  { %p217_p7 = pnand %p216_p6, %p210_p3 }
  0x10   :  { %220 = shalt.err (!%p217_p7)
}
  0x11   :  { %s272_s22 = smov 64   ;;  %s273_s23 = smov 4  }
  0x12   :  { %22 = dma.hbm_to_vmem [thread:$0]  %s350_s0, 128, %s17_s13, [#allocation4], %s272_s22, %s272_s22, %s273_s23  }
  0x13   :  { %s274_s26 = smov [#allocation6]   ;;  %s221_s30 = scalar_lea.hbm %s351_s1, 256 }
  0x14   :  { %s28_s27 = sshll.u32 %s274_s26, 4  ;;  %p222_p8 = scmp.ne.s32.totalorder %s351_s1, %s221_s30  ;;  %s29_s27 = int_to_ptr.vmem [resolvable:$true] %s28_s27 }
  0x15   :  { %p225_p9 = scmp.lt.u32.totalorder %s221_s30, %s351_s1 }
  0x17   :  { %p227_p10 = pnand %p225_p9, %p222_p8 }
  0x19   :  { %230 = shalt.err (!%p227_p10)
}
  0x1a   :  { %s231_s8 = scalar_lea.vmem %s29_s27, 256  ;;  %p236_p12 = scmp.lt.s32.totalorder %s29_s27, %s29_s27 }
  0x1b   :  { %p232_p11 = scmp.ne.s32.totalorder %s29_s27, %s231_s8  ;;  %p237_p13 = scmp.lt.s32.totalorder %s231_s8, %s231_s8 }
  0x1d   :  { %p238_p0 = por %p237_p13, %p236_p12 }
  0x1f   :  { %p239_p1 = pnand %p238_p0, %p232_p11 }
  0x21   :  { %242 = shalt.err (!%p239_p1)
}
  0x22   :  { %34 = dma.hbm_to_vmem [thread:$0]  %s351_s1, 256, %s29_s27, [#allocation7], %s272_s22, %s272_s22, %s273_s23  }
  0x23   :  { %265 = dma.done.wait [#allocation4], 128  }
  0x24   :  { %266 = vsyncadd [#allocation4], 4294967168 }
  0x25   :  { %267 = dma.done.wait [#allocation7], 256  }
  0x26   :  { %268 = vsyncadd [#allocation7], 4294967040  ;;  %vm48_vm0 = vcmask 785408   ;;  %v275_v0 = vmov 0.0   ;;  %vm276_vm1 = vmmov 0   ;;  %v196_v1 = vld [vmem:[#allocation6] sm:$0xff]  }
  0x27   :  { %49 = vst.msk [vmem:[#allocation2] sm:$0xff] %vm48_vm0, %v275_v0  ;;  %50 = vst.msk [vmem:[#allocation2 + $0x8] sm:$0xff] %vm48_vm0, %v275_v0  ;;  %181 = vmatprep.subr.bf16.mxu0 %v275_v0  ;;  %185 = vmatprep.mubr.msk.bf16.mxu0 %vm276_vm1, %v275_v0  ;;  %v197_v2 = vld [vmem:[#allocation6 + $0x8] sm:$0xff]   ;;  %v198_v3 = vld [vmem:[#allocation3] sm:$0xff]   ;;  %vm76_vm2 = vcmask 261120   ;;  %vm148_vm3 = vcmask 781312  }
  0x28   :  { %182 = vmatpush3.bf16.msra.mxu0 %v196_v1  ;;  %v173_v12 = vld [vmem:[%s352_s2] ss:$0 sm:$0xff]  ;;  %s277_s11 = smov [#allocation8]  }
  0x29   :  { %183 = vmatprep.subr.bf16.mxu0 %v275_v0  ;;  %s156_s12 = sshll.u32 %s277_s11, 4  ;;  %s157_s12 = int_to_ptr.vmem [resolvable:$true] %s156_s12 }
  0x2a   :  { %s243_s13 = scalar_lea.vmem %s157_s12, 128  ;;  %p248_p3 = scmp.lt.s32.totalorder %s157_s12, %s157_s12 }
  0x2b   :  { %p244_p2 = scmp.ne.s32.totalorder %s157_s12, %s243_s13  ;;  %p249_p4 = scmp.lt.s32.totalorder %s243_s13, %s243_s13 }
  0x2c   :  { %184 = vmatpush3.bf16.msra.mxu0 %v197_v2 }
  0x2d   :  { %p250_p5 = por %p249_p4, %p248_p3 }
  0x2e   :  { %v51_v4 = vld [vmem:[#allocation2] sm:$0xff]  ;;  %v52_v6 = vld [vmem:[#allocation2 + $0x8] sm:$0xff] }
  0x2f   :  { %186 = vmatmul.mubr.msk.bf16.vlgmr.msra.gmra.mrb[0].mxu0 %vm76_vm2, %v198_v3  ;;  %p251_p6 = pnand %p250_p5, %p244_p2 }
 0x102   :  { %v114_v5 = vpop.f32.mrb[0].mxu0 }
 0x103   :  { %v121_v7 = vadd.f32 %v114_v5, %v51_v4  ;;  %v187_v8 = vpop.f32.mrb[1].mxu0 }
 0x104   :  { %v117_v9 = vpop.f32.mrb[2].mxu0 }
 0x105   :  { %124 = vst.msk [vmem:[#allocation2] sm:$0xff] %vm48_vm0, %v121_v7  ;;  %v122_v10 = vadd.f32 %v117_v9, %v52_v6  ;;  %v188_v11 = vpop.f32.mrb[3].mxu0 }
 0x107   :  { %125 = vst.msk [vmem:[#allocation2 + $0x8] sm:$0xff] %vm48_vm0, %v122_v10 }
 0x10c   :  { %v129_v13 = vld [vmem:[#allocation2] sm:$0xff] }
 0x10d   :  { %v138_v14 = vadd.f32 %v173_v12, %v129_v13 }
 0x10e   :  { %v130_v15 = vld [vmem:[#allocation2 + $0x8] sm:$0xff] }
 0x10f   :  { %v139_v16 = vadd.f32 %v173_v12, %v130_v15  ;;  %v176_v17 = vpack.c.bf16 %v138_v14, %v138_v14 }
 0x111   :  { %v177_v18 = vpack.c.bf16 %v139_v16, %v139_v16  ;;  %149 = vst.msk [vmem:[#allocation8] sm:$0xf] %vm148_vm3, %v176_v17 }
 0x113   :  { %150 = vst.msk [vmem:[#allocation8 + $0x4] sm:$0xf] %vm148_vm3, %v177_v18 }
 0x114   :  { %254 = shalt.err (!%p251_p6)
}
 0x115   :  { %s255_s15 = scalar_lea.hbm %s353_s3, 128 }
 0x116   :  { %p256_p7 = scmp.ne.s32.totalorder %s353_s3, %s255_s15  ;;  %p259_p8 = scmp.lt.u32.totalorder %s255_s15, %s353_s3 }
 0x118   :  { %p261_p9 = pnand %p259_p8, %p256_p7 }
 0x11a   :  { %264 = shalt.err (!%p261_p9)
}
 0x11b   :  { %162 = dma.vmem_to_hbm [thread:$0]  %s157_s12, 128, %s353_s3, [#allocation5], %s272_s22, %s272_s22, %s273_s23  }
 0x11c   :  { %269 = dma.done.wait [#allocation5], 128  }
 0x11d   :  { %270 = vsyncadd [#allocation5], 4294967168 }
 0x11e   :  { %166 = vsyncpa [#allocation4], 1 }
 0x11f   :  { %167 = vsyncpa [#allocation7], 1 }
 0x120   :  { %168 = vsyncpa [#allocation5], 1 }

</bundles_post_ra>
